<compile_context>
chip_gen: v7x
topology: tpu7x:2x2x1
jax: 0.10.0
libtpu: 0.0.40
codegen_flags: <defaults>
</compile_context>

<pallas_src>
import jax
import jax.numpy as jnp
import numpy as np
from jax import lax
from jax.experimental import pallas as pl
from jax.experimental.pallas import tpu as pltpu

LOSS_CHANNEL = 32
LANE = 128          # TPU lane width (last dim of every block)
CHUNK_ROWS = 32     # inner-loop chunk height (multiple of 16 -> whole bf16 vregs)


def _cdiv(a, b):
    return -(-a // b)


def _vmem_capacity_bytes():
    """Best-effort physical VMEM query; conservative (v7x-sized) fallback."""
    try:
        info = pltpu.get_tpu_info()
    except Exception:
        return 64 << 20
    for attr in ("vmem_capacity_bytes", "vmem_size_bytes", "vmem_bytes"):
        v = getattr(info, attr, None)
        if isinstance(v, (int, np.integer)) and int(v) > 0:
            return int(v)
    return 64 << 20


def _make_kernel(tile_rows, chunk_rows, n_chunks, rows_total, inv_m):
    def kernel(*args):
        o_refs = args[:LOSS_CHANNEL]           # 32 x (tile_rows, 128) VMEM
        gt_ref = args[LOSS_CHANNEL]            # (tile_rows, 128) VMEM
        out_ref = args[LOSS_CHANNEL + 1]       # (1, 128) VMEM (resident across grid)
        acc_ref = args[LOSS_CHANNEL + 2]       # (chunk_rows, 128) f32 VMEM accumulator

        k = pl.program_id(0)

        @pl.when(k == 0)
        def _init():
            acc_ref[...] = jnp.zeros_like(acc_ref)

        # Rows of this block that lie inside the real array; rows beyond it hold
        # unspecified data from the clamped DMA and are masked out below.
        valid_rows = rows_total - k * tile_rows
        row_iota = lax.broadcasted_iota(jnp.int32, (chunk_rows, LANE), 0)  # hoisted

        def chunk_body(c, carry):
            r0 = pl.multiple_of(c * chunk_rows, chunk_rows)
            sl = pl.ds(r0, chunk_rows)
            gt_c = gt_ref[sl, :].astype(jnp.float32)                # (chunk_rows, 128)
            sd = jnp.zeros((chunk_rows, LANE), jnp.float32)         # sum_i (G_i - gt)
            ssd = jnp.zeros((chunk_rows, LANE), jnp.float32)        # sum_i (G_i - gt)^2
            for r in o_refs:                                        # unrolled: 32 maps
                d = r[sl, :].astype(jnp.float32) - gt_c
                sd = sd + d
                ssd = ssd + d * d
            comb = (jnp.float32(1.0 - 0.05) * ssd
                    + jnp.float32(0.05 / LOSS_CHANNEL) * (sd * sd))
            mask = row_iota < (valid_rows - c * chunk_rows)
            return carry + jnp.where(mask, comb, jnp.float32(0.0))

        carry = lax.fori_loop(0, n_chunks, chunk_body,
                              jnp.zeros((chunk_rows, LANE), jnp.float32))
        acc_ref[...] = acc_ref[...] + carry

        @pl.when(k == pl.num_programs(0) - 1)
        def _finalize():
            total = jnp.sum(acc_ref[...]) * jnp.float32(inv_m)
            out_ref[...] = jnp.full((1, LANE), total, dtype=jnp.float32)

    return kernel


def hxqloss2(output32list, pred, gt):
    """JAX/Pallas equivalent of hxqloss2.forward.

    `pred` is accepted for API parity but (as in the PyTorch code) it is
    immediately overwritten by the mean of output32list, so it is unused.
    """
    if pred.shape != gt.shape:
        print("Not the same size!!!")
        print("gt.shape = " + str(gt.shape))
        print("pred.shape = " + str(pred.shape))
    assert len(output32list) == LOSS_CHANNEL

    m_true = int(np.prod(gt.shape))
    inv_m = 1.0 / float(m_true)

    def to_stream_dtype(x):
        x = jnp.asarray(x)
        if x.dtype not in (jnp.float32, jnp.bfloat16):
            x = x.astype(jnp.float32)   # bf16 inputs stream as bf16 (half HBM bytes)
        return x

    arrays = [to_stream_dtype(x) for x in output32list] + [to_stream_dtype(gt)]

    if m_true % LANE == 0:
        # Common case: free contiguous bitcast, zero extra HBM traffic.
        rows = m_true // LANE
        arrays2d = [x.reshape(rows, LANE) for x in arrays]
    else:
        # Rare case: element count not lane-aligned. Pad the flat view to the next
        # multiple of 128; padded zeros give d = 0 - 0 = 0 -> contribute exactly 0,
        # and the division uses the true element count.
        # TODO(synk): replace with a tiny JAX epilogue for the <128-element tail to
        # avoid the HBM copy jnp.pad implies in this uncommon case.
        rows = _cdiv(m_true, LANE)
        padded = rows * LANE
        arrays2d = [jnp.pad(x.reshape(-1), (0, padded - m_true)).reshape(rows, LANE)
                    for x in arrays]

    # --- chip-aware tile sizing -------------------------------------------------
    vmem_cap = _vmem_capacity_bytes()
    cap_rows = 1024 if vmem_cap >= (96 << 20) else 512   # v5e/v6e: 1024, v7x: 512

    if rows >= CHUNK_ROWS:
        tile_rows = min(cap_rows, (rows // CHUNK_ROWS) * CHUNK_ROWS)
        chunk_rows = CHUNK_ROWS
    else:
        tile_rows = rows          # block height == full dim (allowed even if not %8)
        chunk_rows = rows
    n_chunks = tile_rows // chunk_rows
    grid_k = _cdiv(rows, tile_rows)

    bytes_per_row_all = sum(np.dtype(a.dtype).itemsize for a in arrays2d) * LANE
    need = 2 * tile_rows * bytes_per_row_all + chunk_rows * LANE * 4 + 2 * LANE * 4
    vmem_limit = int(max(32 << 20, need + (12 << 20)))
    vmem_limit = int(min(vmem_limit, max(32 << 20, vmem_cap - (8 << 20))))

    in_specs = [
        pl.BlockSpec((tile_rows, LANE), lambda k: (k, 0))
        for _ in range(LOSS_CHANNEL + 1)
    ]

    bytes_accessed = sum(int(a.size) * np.dtype(a.dtype).itemsize for a in arrays2d)
    out = pl.pallas_call(
        _make_kernel(tile_rows, chunk_rows, n_chunks, rows, inv_m),
        out_shape=jax.ShapeDtypeStruct((1, LANE), jnp.float32),
        grid_spec=pltpu.PrefetchScalarGridSpec(
            num_scalar_prefetch=0,
            grid=(grid_k,),
            in_specs=in_specs,
            out_specs=pl.BlockSpec((1, LANE), lambda k: (0, 0)),
            scratch_shapes=[pltpu.VMEM((chunk_rows, LANE), jnp.float32)],
        ),
        compiler_params=pltpu.CompilerParams(
            dimension_semantics=("arbitrary",),
            vmem_limit_bytes=vmem_limit,
        ),
        cost_estimate=pl.CostEstimate(
            flops=(4 * LOSS_CHANNEL + 6) * m_true,
            transcendentals=0,
            bytes_accessed=bytes_accessed + LANE * 4,
        ),
    )(*arrays2d)

    return out[0, 0]


def _reference(output32list, gt):
    o = jnp.stack(output32list, axis=0).astype(jnp.float32)
    pred = jnp.sum(o, axis=0) / LOSS_CHANNEL
    loss = jnp.float32(0.0)
    for i in range(LOSS_CHANNEL):
        g = o[i]
        loss = loss + jnp.mean((g - gt) ** 2) - 0.05 * jnp.mean((g - pred) ** 2)
    return loss


if __name__ == "__main__":
    key = jax.random.PRNGKey(0)
    N, H, W = 2, 16, 16  # N*H*W = 512 elements per map (lane-aligned -> zero-copy path)

    keys = jax.random.split(key, LOSS_CHANNEL + 2)
    output32list = [
        jax.random.normal(keys[i], (N, H, W), dtype=jnp.float32)
        for i in range(LOSS_CHANNEL)
    ]
    pred_in = jax.random.normal(keys[LOSS_CHANNEL], (N, H, W), dtype=jnp.float32)
    gt = jax.random.normal(keys[LOSS_CHANNEL + 1], (N, H, W), dtype=jnp.float32)

    loss = jax.block_until_ready(hxqloss2(output32list, pred_in, gt))
    ref = jax.block_until_ready(_reference(output32list, gt))
    np.testing.assert_allclose(np.asarray(loss), np.asarray(ref), rtol=1e-5, atol=1e-5)

    print("KERNEL_OK")
</pallas_src>

<mosaic_0001>
module attributes {stable_mosaic.version = 11 : i64} {
  func.func @kernel(%arg0: i32, %arg1: memref<4x128xf32, #tpu.memory_space<vmem>>, %arg2: memref<4x128xf32, #tpu.memory_space<vmem>>, %arg3: memref<4x128xf32, #tpu.memory_space<vmem>>, %arg4: memref<4x128xf32, #tpu.memory_space<vmem>>, %arg5: memref<4x128xf32, #tpu.memory_space<vmem>>, %arg6: memref<4x128xf32, #tpu.memory_space<vmem>>, %arg7: memref<4x128xf32, #tpu.memory_space<vmem>>, %arg8: memref<4x128xf32, #tpu.memory_space<vmem>>, %arg9: memref<4x128xf32, #tpu.memory_space<vmem>>, %arg10: memref<4x128xf32, #tpu.memory_space<vmem>>, %arg11: memref<4x128xf32, #tpu.memory_space<vmem>>, %arg12: memref<4x128xf32, #tpu.memory_space<vmem>>, %arg13: memref<4x128xf32, #tpu.memory_space<vmem>>, %arg14: memref<4x128xf32, #tpu.memory_space<vmem>>, %arg15: memref<4x128xf32, #tpu.memory_space<vmem>>, %arg16: memref<4x128xf32, #tpu.memory_space<vmem>>, %arg17: memref<4x128xf32, #tpu.memory_space<vmem>>, %arg18: memref<4x128xf32, #tpu.memory_space<vmem>>, %arg19: memref<4x128xf32, #tpu.memory_space<vmem>>, %arg20: memref<4x128xf32, #tpu.memory_space<vmem>>, %arg21: memref<4x128xf32, #tpu.memory_space<vmem>>, %arg22: memref<4x128xf32, #tpu.memory_space<vmem>>, %arg23: memref<4x128xf32, #tpu.memory_space<vmem>>, %arg24: memref<4x128xf32, #tpu.memory_space<vmem>>, %arg25: memref<4x128xf32, #tpu.memory_space<vmem>>, %arg26: memref<4x128xf32, #tpu.memory_space<vmem>>, %arg27: memref<4x128xf32, #tpu.memory_space<vmem>>, %arg28: memref<4x128xf32, #tpu.memory_space<vmem>>, %arg29: memref<4x128xf32, #tpu.memory_space<vmem>>, %arg30: memref<4x128xf32, #tpu.memory_space<vmem>>, %arg31: memref<4x128xf32, #tpu.memory_space<vmem>>, %arg32: memref<4x128xf32, #tpu.memory_space<vmem>>, %arg33: memref<4x128xf32, #tpu.memory_space<vmem>>, %arg34: memref<1x128xf32, #tpu.memory_space<vmem>>, %arg35: memref<4x128xf32, #tpu.memory_space<vmem>>) attributes {dimension_semantics = [#tpu.dimension_semantics<arbitrary>], iteration_bounds = array<i64: 1>, scalar_prefetch = 0 : i64, scratch_operands = 1 : i64, tpu.core_type = #tpu.core_type<tc>, window_params = [{transform_indices = @transform_0, window_bounds = array<i64: 4, 128>}, {transform_indices = @transform_1, window_bounds = array<i64: 4, 128>}, {transform_indices = @transform_2, window_bounds = array<i64: 4, 128>}, {transform_indices = @transform_3, window_bounds = array<i64: 4, 128>}, {transform_indices = @transform_4, window_bounds = array<i64: 4, 128>}, {transform_indices = @transform_5, window_bounds = array<i64: 4, 128>}, {transform_indices = @transform_6, window_bounds = array<i64: 4, 128>}, {transform_indices = @transform_7, window_bounds = array<i64: 4, 128>}, {transform_indices = @transform_8, window_bounds = array<i64: 4, 128>}, {transform_indices = @transform_9, window_bounds = array<i64: 4, 128>}, {transform_indices = @transform_10, window_bounds = array<i64: 4, 128>}, {transform_indices = @transform_11, window_bounds = array<i64: 4, 128>}, {transform_indices = @transform_12, window_bounds = array<i64: 4, 128>}, {transform_indices = @transform_13, window_bounds = array<i64: 4, 128>}, {transform_indices = @transform_14, window_bounds = array<i64: 4, 128>}, {transform_indices = @transform_15, window_bounds = array<i64: 4, 128>}, {transform_indices = @transform_16, window_bounds = array<i64: 4, 128>}, {transform_indices = @transform_17, window_bounds = array<i64: 4, 128>}, {transform_indices = @transform_18, window_bounds = array<i64: 4, 128>}, {transform_indices = @transform_19, window_bounds = array<i64: 4, 128>}, {transform_indices = @transform_20, window_bounds = array<i64: 4, 128>}, {transform_indices = @transform_21, window_bounds = array<i64: 4, 128>}, {transform_indices = @transform_22, window_bounds = array<i64: 4, 128>}, {transform_indices = @transform_23, window_bounds = array<i64: 4, 128>}, {transform_indices = @transform_24, window_bounds = array<i64: 4, 128>}, {transform_indices = @transform_25, window_bounds = array<i64: 4, 128>}, {transform_indices = @transform_26, window_bounds = array<i64: 4, 128>}, {transform_indices = @transform_27, window_bounds = array<i64: 4, 128>}, {transform_indices = @transform_28, window_bounds = array<i64: 4, 128>}, {transform_indices = @transform_29, window_bounds = array<i64: 4, 128>}, {transform_indices = @transform_30, window_bounds = array<i64: 4, 128>}, {transform_indices = @transform_31, window_bounds = array<i64: 4, 128>}, {transform_indices = @transform_32, window_bounds = array<i64: 4, 128>}, {pipeline_mode = #tpu.pipeline_mode<synchronous>, transform_indices = @transform_33, window_bounds = array<i64: 1, 128>}]} {
    %c0_i32 = arith.constant 0 : i32
    %0 = arith.cmpi eq, %arg0, %c0_i32 : i32
    %1 = arith.extui %0 : i1 to i32
    %c0_i32_0 = arith.constant 0 : i32
    %2 = arith.cmpi ne, %1, %c0_i32_0 : i32
    scf.if %2 {
      %cst_48 = arith.constant 0.000000e+00 : f32
      %224 = vector.broadcast %cst_48 : f32 to vector<4x128xf32>
      %c0_49 = arith.constant 0 : index
      %c0_50 = arith.constant 0 : index
      %225 = vector.load %arg35[%c0_49, %c0_50] : memref<4x128xf32, #tpu.memory_space<vmem>>, vector<4x128xf32>
      tpu.vector_store %arg35[%c0_49, %c0_50], %224 {strides = array<i32>} : memref<4x128xf32, #tpu.memory_space<vmem>>, vector<4x128xf32>,
    } else {
    }
    %c4_i32 = arith.constant 4 : i32
    %3 = arith.muli %arg0, %c4_i32 : i32
    %c4_i32_1 = arith.constant 4 : i32
    %4 = arith.subi %c4_i32_1, %3 : i32
    %5 = tpu.iota {dimensions = array<i32: 0>} : vector<4x128xi32>
    %cst = arith.constant 0.000000e+00 : f32
    %6 = vector.broadcast %cst : f32 to vector<4x128xf32>
    %c0_i32_2 = arith.constant 0 : i32
    %c4_i32_3 = arith.constant 4 : i32
    %7 = arith.muli %c0_i32_2, %c4_i32_3 : i32
    %8 = tpu.assume_multiple %7, 4 : i32
    %9 = arith.index_cast %8 : i32 to index
    %c0 = arith.constant 0 : index
    %10 = vector.load %arg33[%9, %c0] : memref<4x128xf32, #tpu.memory_space<vmem>>, vector<4x128xf32>
    %cst_4 = arith.constant 0.000000e+00 : f32
    %11 = vector.broadcast %cst_4 : f32 to vector<4x128xf32>
    %cst_5 = arith.constant 0.000000e+00 : f32
    %12 = vector.broadcast %cst_5 : f32 to vector<4x128xf32>
    %13 = arith.index_cast %8 : i32 to index
    %c0_6 = arith.constant 0 : index
    %14 = vector.load %arg1[%13, %c0_6] : memref<4x128xf32, #tpu.memory_space<vmem>>, vector<4x128xf32>
    %15 = arith.subf %14, %10 : vector<4x128xf32>
    %16 = arith.addf %11, %15 : vector<4x128xf32>
    %17 = arith.mulf %15, %15 : vector<4x128xf32>
    %18 = arith.addf %12, %17 : vector<4x128xf32>
    %19 = arith.index_cast %8 : i32 to index
    %c0_7 = arith.constant 0 : index
    %20 = vector.load %arg2[%19, %c0_7] : memref<4x128xf32, #tpu.memory_space<vmem>>, vector<4x128xf32>
    %21 = arith.subf %20, %10 : vector<4x128xf32>
    %22 = arith.addf %16, %21 : vector<4x128xf32>
    %23 = arith.mulf %21, %21 : vector<4x128xf32>
    %24 = arith.addf %18, %23 : vector<4x128xf32>
    %25 = arith.index_cast %8 : i32 to index
    %c0_8 = arith.constant 0 : index
    %26 = vector.load %arg3[%25, %c0_8] : memref<4x128xf32, #tpu.memory_space<vmem>>, vector<4x128xf32>
    %27 = arith.subf %26, %10 : vector<4x128xf32>
    %28 = arith.addf %22, %27 : vector<4x128xf32>
    %29 = arith.mulf %27, %27 : vector<4x128xf32>
    %30 = arith.addf %24, %29 : vector<4x128xf32>
    %31 = arith.index_cast %8 : i32 to index
    %c0_9 = arith.constant 0 : index
    %32 = vector.load %arg4[%31, %c0_9] : memref<4x128xf32, #tpu.memory_space<vmem>>, vector<4x128xf32>
    %33 = arith.subf %32, %10 : vector<4x128xf32>
    %34 = arith.addf %28, %33 : vector<4x128xf32>
    %35 = arith.mulf %33, %33 : vector<4x128xf32>
    %36 = arith.addf %30, %35 : vector<4x128xf32>
    %37 = arith.index_cast %8 : i32 to index
    %c0_10 = arith.constant 0 : index
    %38 = vector.load %arg5[%37, %c0_10] : memref<4x128xf32, #tpu.memory_space<vmem>>, vector<4x128xf32>
    %39 = arith.subf %38, %10 : vector<4x128xf32>
    %40 = arith.addf %34, %39 : vector<4x128xf32>
    %41 = arith.mulf %39, %39 : vector<4x128xf32>
    %42 = arith.addf %36, %41 : vector<4x128xf32>
    %43 = arith.index_cast %8 : i32 to index
    %c0_11 = arith.constant 0 : index
    %44 = vector.load %arg6[%43, %c0_11] : memref<4x128xf32, #tpu.memory_space<vmem>>, vector<4x128xf32>
    %45 = arith.subf %44, %10 : vector<4x128xf32>
    %46 = arith.addf %40, %45 : vector<4x128xf32>
    %47 = arith.mulf %45, %45 : vector<4x128xf32>
    %48 = arith.addf %42, %47 : vector<4x128xf32>
    %49 = arith.index_cast %8 : i32 to index
    %c0_12 = arith.constant 0 : index
    %50 = vector.load %arg7[%49, %c0_12] : memref<4x128xf32, #tpu.memory_space<vmem>>, vector<4x128xf32>
    %51 = arith.subf %50, %10 : vector<4x128xf32>
    %52 = arith.addf %46, %51 : vector<4x128xf32>
    %53 = arith.mulf %51, %51 : vector<4x128xf32>
    %54 = arith.addf %48, %53 : vector<4x128xf32>
    %55 = arith.index_cast %8 : i32 to index
    %c0_13 = arith.constant 0 : index
    %56 = vector.load %arg8[%55, %c0_13] : memref<4x128xf32, #tpu.memory_space<vmem>>, vector<4x128xf32>
    %57 = arith.subf %56, %10 : vector<4x128xf32>
    %58 = arith.addf %52, %57 : vector<4x128xf32>
    %59 = arith.mulf %57, %57 : vector<4x128xf32>
    %60 = arith.addf %54, %59 : vector<4x128xf32>
    %61 = arith.index_cast %8 : i32 to index
    %c0_14 = arith.constant 0 : index
    %62 = vector.load %arg9[%61, %c0_14] : memref<4x128xf32, #tpu.memory_space<vmem>>, vector<4x128xf32>
    %63 = arith.subf %62, %10 : vector<4x128xf32>
    %64 = arith.addf %58, %63 : vector<4x128xf32>
    %65 = arith.mulf %63, %63 : vector<4x128xf32>
    %66 = arith.addf %60, %65 : vector<4x128xf32>
    %67 = arith.index_cast %8 : i32 to index
    %c0_15 = arith.constant 0 : index
    %68 = vector.load %arg10[%67, %c0_15] : memref<4x128xf32, #tpu.memory_space<vmem>>, vector<4x128xf32>
    %69 = arith.subf %68, %10 : vector<4x128xf32>
    %70 = arith.addf %64, %69 : vector<4x128xf32>
    %71 = arith.mulf %69, %69 : vector<4x128xf32>
    %72 = arith.addf %66, %71 : vector<4x128xf32>
    %73 = arith.index_cast %8 : i32 to index
    %c0_16 = arith.constant 0 : index
    %74 = vector.load %arg11[%73, %c0_16] : memref<4x128xf32, #tpu.memory_space<vmem>>, vector<4x128xf32>
    %75 = arith.subf %74, %10 : vector<4x128xf32>
    %76 = arith.addf %70, %75 : vector<4x128xf32>
    %77 = arith.mulf %75, %75 : vector<4x128xf32>
    %78 = arith.addf %72, %77 : vector<4x128xf32>
    %79 = arith.index_cast %8 : i32 to index
    %c0_17 = arith.constant 0 : index
    %80 = vector.load %arg12[%79, %c0_17] : memref<4x128xf32, #tpu.memory_space<vmem>>, vector<4x128xf32>
    %81 = arith.subf %80, %10 : vector<4x128xf32>
    %82 = arith.addf %76, %81 : vector<4x128xf32>
    %83 = arith.mulf %81, %81 : vector<4x128xf32>
    %84 = arith.addf %78, %83 : vector<4x128xf32>
    %85 = arith.index_cast %8 : i32 to index
    %c0_18 = arith.constant 0 : index
    %86 = vector.load %arg13[%85, %c0_18] : memref<4x128xf32, #tpu.memory_space<vmem>>, vector<4x128xf32>
    %87 = arith.subf %86, %10 : vector<4x128xf32>
    %88 = arith.addf %82, %87 : vector<4x128xf32>
    %89 = arith.mulf %87, %87 : vector<4x128xf32>
    %90 = arith.addf %84, %89 : vector<4x128xf32>
    %91 = arith.index_cast %8 : i32 to index
    %c0_19 = arith.constant 0 : index
    %92 = vector.load %arg14[%91, %c0_19] : memref<4x128xf32, #tpu.memory_space<vmem>>, vector<4x128xf32>
    %93 = arith.subf %92, %10 : vector<4x128xf32>
    %94 = arith.addf %88, %93 : vector<4x128xf32>
    %95 = arith.mulf %93, %93 : vector<4x128xf32>
    %96 = arith.addf %90, %95 : vector<4x128xf32>
    %97 = arith.index_cast %8 : i32 to index
    %c0_20 = arith.constant 0 : index
    %98 = vector.load %arg15[%97, %c0_20] : memref<4x128xf32, #tpu.memory_space<vmem>>, vector<4x128xf32>
    %99 = arith.subf %98, %10 : vector<4x128xf32>
    %100 = arith.addf %94, %99 : vector<4x128xf32>
    %101 = arith.mulf %99, %99 : vector<4x128xf32>
    %102 = arith.addf %96, %101 : vector<4x128xf32>
    %103 = arith.index_cast %8 : i32 to index
    %c0_21 = arith.constant 0 : index
    %104 = vector.load %arg16[%103, %c0_21] : memref<4x128xf32, #tpu.memory_space<vmem>>, vector<4x128xf32>
    %105 = arith.subf %104, %10 : vector<4x128xf32>
    %106 = arith.addf %100, %105 : vector<4x128xf32>
    %107 = arith.mulf %105, %105 : vector<4x128xf32>
    %108 = arith.addf %102, %107 : vector<4x128xf32>
    %109 = arith.index_cast %8 : i32 to index
    %c0_22 = arith.constant 0 : index
    %110 = vector.load %arg17[%109, %c0_22] : memref<4x128xf32, #tpu.memory_space<vmem>>, vector<4x128xf32>
    %111 = arith.subf %110, %10 : vector<4x128xf32>
    %112 = arith.addf %106, %111 : vector<4x128xf32>
    %113 = arith.mulf %111, %111 : vector<4x128xf32>
    %114 = arith.addf %108, %113 : vector<4x128xf32>
    %115 = arith.index_cast %8 : i32 to index
    %c0_23 = arith.constant 0 : index
    %116 = vector.load %arg18[%115, %c0_23] : memref<4x128xf32, #tpu.memory_space<vmem>>, vector<4x128xf32>
    %117 = arith.subf %116, %10 : vector<4x128xf32>
    %118 = arith.addf %112, %117 : vector<4x128xf32>
    %119 = arith.mulf %117, %117 : vector<4x128xf32>
    %120 = arith.addf %114, %119 : vector<4x128xf32>
    %121 = arith.index_cast %8 : i32 to index
    %c0_24 = arith.constant 0 : index
    %122 = vector.load %arg19[%121, %c0_24] : memref<4x128xf32, #tpu.memory_space<vmem>>, vector<4x128xf32>
    %123 = arith.subf %122, %10 : vector<4x128xf32>
    %124 = arith.addf %118, %123 : vector<4x128xf32>
    %125 = arith.mulf %123, %123 : vector<4x128xf32>
    %126 = arith.addf %120, %125 : vector<4x128xf32>
    %127 = arith.index_cast %8 : i32 to index
    %c0_25 = arith.constant 0 : index
    %128 = vector.load %arg20[%127, %c0_25] : memref<4x128xf32, #tpu.memory_space<vmem>>, vector<4x128xf32>
    %129 = arith.subf %128, %10 : vector<4x128xf32>
    %130 = arith.addf %124, %129 : vector<4x128xf32>
    %131 = arith.mulf %129, %129 : vector<4x128xf32>
    %132 = arith.addf %126, %131 : vector<4x128xf32>
    %133 = arith.index_cast %8 : i32 to index
    %c0_26 = arith.constant 0 : index
    %134 = vector.load %arg21[%133, %c0_26] : memref<4x128xf32, #tpu.memory_space<vmem>>, vector<4x128xf32>
    %135 = arith.subf %134, %10 : vector<4x128xf32>
    %136 = arith.addf %130, %135 : vector<4x128xf32>
    %137 = arith.mulf %135, %135 : vector<4x128xf32>
    %138 = arith.addf %132, %137 : vector<4x128xf32>
    %139 = arith.index_cast %8 : i32 to index
    %c0_27 = arith.constant 0 : index
    %140 = vector.load %arg22[%139, %c0_27] : memref<4x128xf32, #tpu.memory_space<vmem>>, vector<4x128xf32>
    %141 = arith.subf %140, %10 : vector<4x128xf32>
    %142 = arith.addf %136, %141 : vector<4x128xf32>
    %143 = arith.mulf %141, %141 : vector<4x128xf32>
    %144 = arith.addf %138, %143 : vector<4x128xf32>
    %145 = arith.index_cast %8 : i32 to index
    %c0_28 = arith.constant 0 : index
    %146 = vector.load %arg23[%145, %c0_28] : memref<4x128xf32, #tpu.memory_space<vmem>>, vector<4x128xf32>
    %147 = arith.subf %146, %10 : vector<4x128xf32>
    %148 = arith.addf %142, %147 : vector<4x128xf32>
    %149 = arith.mulf %147, %147 : vector<4x128xf32>
    %150 = arith.addf %144, %149 : vector<4x128xf32>
    %151 = arith.index_cast %8 : i32 to index
    %c0_29 = arith.constant 0 : index
    %152 = vector.load %arg24[%151, %c0_29] : memref<4x128xf32, #tpu.memory_space<vmem>>, vector<4x128xf32>
    %153 = arith.subf %152, %10 : vector<4x128xf32>
    %154 = arith.addf %148, %153 : vector<4x128xf32>
    %155 = arith.mulf %153, %153 : vector<4x128xf32>
    %156 = arith.addf %150, %155 : vector<4x128xf32>
    %157 = arith.index_cast %8 : i32 to index
    %c0_30 = arith.constant 0 : index
    %158 = vector.load %arg25[%157, %c0_30] : memref<4x128xf32, #tpu.memory_space<vmem>>, vector<4x128xf32>
    %159 = arith.subf %158, %10 : vector<4x128xf32>
    %160 = arith.addf %154, %159 : vector<4x128xf32>
    %161 = arith.mulf %159, %159 : vector<4x128xf32>
    %162 = arith.addf %156, %161 : vector<4x128xf32>
    %163 = arith.index_cast %8 : i32 to index
    %c0_31 = arith.constant 0 : index
    %164 = vector.load %arg26[%163, %c0_31] : memref<4x128xf32, #tpu.memory_space<vmem>>, vector<4x128xf32>
    %165 = arith.subf %164, %10 : vector<4x128xf32>
    %166 = arith.addf %160, %165 : vector<4x128xf32>
    %167 = arith.mulf %165, %165 : vector<4x128xf32>
    %168 = arith.addf %162, %167 : vector<4x128xf32>
    %169 = arith.index_cast %8 : i32 to index
    %c0_32 = arith.constant 0 : index
    %170 = vector.load %arg27[%169, %c0_32] : memref<4x128xf32, #tpu.memory_space<vmem>>, vector<4x128xf32>
    %171 = arith.subf %170, %10 : vector<4x128xf32>
    %172 = arith.addf %166, %171 : vector<4x128xf32>
    %173 = arith.mulf %171, %171 : vector<4x128xf32>
    %174 = arith.addf %168, %173 : vector<4x128xf32>
    %175 = arith.index_cast %8 : i32 to index
    %c0_33 = arith.constant 0 : index
    %176 = vector.load %arg28[%175, %c0_33] : memref<4x128xf32, #tpu.memory_space<vmem>>, vector<4x128xf32>
    %177 = arith.subf %176, %10 : vector<4x128xf32>
    %178 = arith.addf %172, %177 : vector<4x128xf32>
    %179 = arith.mulf %177, %177 : vector<4x128xf32>
    %180 = arith.addf %174, %179 : vector<4x128xf32>
    %181 = arith.index_cast %8 : i32 to index
    %c0_34 = arith.constant 0 : index
    %182 = vector.load %arg29[%181, %c0_34] : memref<4x128xf32, #tpu.memory_space<vmem>>, vector<4x128xf32>
    %183 = arith.subf %182, %10 : vector<4x128xf32>
    %184 = arith.addf %178, %183 : vector<4x128xf32>
    %185 = arith.mulf %183, %183 : vector<4x128xf32>
    %186 = arith.addf %180, %185 : vector<4x128xf32>
    %187 = arith.index_cast %8 : i32 to index
    %c0_35 = arith.constant 0 : index
    %188 = vector.load %arg30[%187, %c0_35] : memref<4x128xf32, #tpu.memory_space<vmem>>, vector<4x128xf32>
    %189 = arith.subf %188, %10 : vector<4x128xf32>
    %190 = arith.addf %184, %189 : vector<4x128xf32>
    %191 = arith.mulf %189, %189 : vector<4x128xf32>
    %192 = arith.addf %186, %191 : vector<4x128xf32>
    %193 = arith.index_cast %8 : i32 to index
    %c0_36 = arith.constant 0 : index
    %194 = vector.load %arg31[%193, %c0_36] : memref<4x128xf32, #tpu.memory_space<vmem>>, vector<4x128xf32>
    %195 = arith.subf %194, %10 : vector<4x128xf32>
    %196 = arith.addf %190, %195 : vector<4x128xf32>
    %197 = arith.mulf %195, %195 : vector<4x128xf32>
    %198 = arith.addf %192, %197 : vector<4x128xf32>
    %199 = arith.index_cast %8 : i32 to index
    %c0_37 = arith.constant 0 : index
    %200 = vector.load %arg32[%199, %c0_37] : memref<4x128xf32, #tpu.memory_space<vmem>>, vector<4x128xf32>
    %201 = arith.subf %200, %10 : vector<4x128xf32>
    %202 = arith.addf %196, %201 : vector<4x128xf32>
    %203 = arith.mulf %201, %201 : vector<4x128xf32>
    %204 = arith.addf %198, %203 : vector<4x128xf32>
    %cst_38 = arith.constant 0.949999988 : f32
    %205 = vector.broadcast %cst_38 : f32 to vector<4x128xf32>
    %206 = arith.mulf %205, %204 : vector<4x128xf32>
    %207 = arith.mulf %202, %202 : vector<4x128xf32>
    %cst_39 = arith.constant 1.562500e-03 : f32
    %208 = vector.broadcast %cst_39 : f32 to vector<4x128xf32>
    %209 = arith.mulf %208, %207 : vector<4x128xf32>
    %210 = arith.addf %206, %209 : vector<4x128xf32>
    %c4_i32_40 = arith.constant 4 : i32
    %211 = arith.muli %c0_i32_2, %c4_i32_40 : i32
    %212 = arith.subi %4, %211 : i32
    %213 = vector.broadcast %212 : i32 to vector<4x128xi32>
    %214 = arith.cmpi slt, %5, %213 : vector<4x128xi32>
    %cst_41 = arith.constant 0.000000e+00 : f32
    %215 = vector.broadcast %cst_41 : f32 to vector<4x128xf32>
    %216 = arith.select %214, %210, %215 : vector<4x128xi1>, vector<4x128xf32>
    %217 = arith.addf %6, %216 : vector<4x128xf32>
    %c1_i32 = arith.constant 1 : i32
    %c0_42 = arith.constant 0 : index
    %c0_43 = arith.constant 0 : index
    %218 = vector.load %arg35[%c0_42, %c0_43] : memref<4x128xf32, #tpu.memory_space<vmem>>, vector<4x128xf32>
    %219 = arith.addf %218, %217 : vector<4x128xf32>
    %c0_44 = arith.constant 0 : index
    %c0_45 = arith.constant 0 : index
    %220 = vector.load %arg35[%c0_44, %c0_45] : memref<4x128xf32, #tpu.memory_space<vmem>>, vector<4x128xf32>
    tpu.vector_store %arg35[%c0_44, %c0_45], %219 {strides = array<i32>} : memref<4x128xf32, #tpu.memory_space<vmem>>, vector<4x128xf32>,
    %c0_i32_46 = arith.constant 0 : i32
    %221 = arith.cmpi eq, %arg0, %c0_i32_46 : i32
    %222 = arith.extui %221 : i1 to i32
    %c0_i32_47 = arith.constant 0 : i32
    %223 = arith.cmpi ne, %222, %c0_i32_47 : i32
    scf.if %223 {
      %c0_48 = arith.constant 0 : index
      %c0_49 = arith.constant 0 : index
      %224 = vector.load %arg35[%c0_48, %c0_49] : memref<4x128xf32, #tpu.memory_space<vmem>>, vector<4x128xf32>
      %225 = vector.shape_cast %224 : vector<4x128xf32> to vector<1x4x128xf32>
      %cst_50 = arith.constant dense<0.000000e+00> : vector<1xf32>
      %226 = vector.multi_reduction <add>, %225, %cst_50 [1, 2] : vector<1x4x128xf32> to vector<1xf32>
      %227 = vector.shape_cast %226 : vector<1xf32> to vector<1x1x1xf32>
      %228 = vector.extract %227[0, 0, 0] : f32 from vector<1x1x1xf32>
      %cst_51 = arith.constant 0.001953125 : f32
      %229 = arith.mulf %228, %cst_51 : f32
      %230 = vector.broadcast %229 : f32 to vector<1x128xf32>
      %c0_52 = arith.constant 0 : index
      %c0_53 = arith.constant 0 : index
      %231 = vector.load %arg34[%c0_52, %c0_53] : memref<1x128xf32, #tpu.memory_space<vmem>>, vector<1x128xf32>
      tpu.vector_store %arg34[%c0_52, %c0_53], %230 {strides = array<i32>} : memref<1x128xf32, #tpu.memory_space<vmem>>, vector<1x128xf32>,
    } else {
    }
    return
  }
  func.func @transform_0(%arg0: i32) -> (i32, i32) {
    %c0_i32 = arith.constant 0 : i32
    %c0_i32_0 = arith.constant 0 : i32
    return %arg0, %c0_i32 : i32, i32
  }
  func.func @transform_1(%arg0: i32) -> (i32, i32) {
    %c0_i32 = arith.constant 0 : i32
    %c0_i32_0 = arith.constant 0 : i32
    return %arg0, %c0_i32 : i32, i32
  }
  func.func @transform_2(%arg0: i32) -> (i32, i32) {
    %c0_i32 = arith.constant 0 : i32
    %c0_i32_0 = arith.constant 0 : i32
    return %arg0, %c0_i32 : i32, i32
  }
  func.func @transform_3(%arg0: i32) -> (i32, i32) {
    %c0_i32 = arith.constant 0 : i32
    %c0_i32_0 = arith.constant 0 : i32
    return %arg0, %c0_i32 : i32, i32
  }
  func.func @transform_4(%arg0: i32) -> (i32, i32) {
    %c0_i32 = arith.constant 0 : i32
    %c0_i32_0 = arith.constant 0 : i32
    return %arg0, %c0_i32 : i32, i32
  }
  func.func @transform_5(%arg0: i32) -> (i32, i32) {
    %c0_i32 = arith.constant 0 : i32
    %c0_i32_0 = arith.constant 0 : i32
    return %arg0, %c0_i32 : i32, i32
  }
  func.func @transform_6(%arg0: i32) -> (i32, i32) {
    %c0_i32 = arith.constant 0 : i32
    %c0_i32_0 = arith.constant 0 : i32
    return %arg0, %c0_i32 : i32, i32
  }
  func.func @transform_7(%arg0: i32) -> (i32, i32) {
    %c0_i32 = arith.constant 0 : i32
    %c0_i32_0 = arith.constant 0 : i32
    return %arg0, %c0_i32 : i32, i32
  }
  func.func @transform_8(%arg0: i32) -> (i32, i32) {
    %c0_i32 = arith.constant 0 : i32
    %c0_i32_0 = arith.constant 0 : i32
    return %arg0, %c0_i32 : i32, i32
  }
  func.func @transform_9(%arg0: i32) -> (i32, i32) {
    %c0_i32 = arith.constant 0 : i32
    %c0_i32_0 = arith.constant 0 : i32
    return %arg0, %c0_i32 : i32, i32
  }
  func.func @transform_10(%arg0: i32) -> (i32, i32) {
    %c0_i32 = arith.constant 0 : i32
    %c0_i32_0 = arith.constant 0 : i32
    return %arg0, %c0_i32 : i32, i32
  }
  func.func @transform_11(%arg0: i32) -> (i32, i32) {
    %c0_i32 = arith.constant 0 : i32
    %c0_i32_0 = arith.constant 0 : i32
    return %arg0, %c0_i32 : i32, i32
  }
  func.func @transform_12(%arg0: i32) -> (i32, i32) {
    %c0_i32 = arith.constant 0 : i32
    %c0_i32_0 = arith.constant 0 : i32
    return %arg0, %c0_i32 : i32, i32
  }
  func.func @transform_13(%arg0: i32) -> (i32, i32) {
    %c0_i32 = arith.constant 0 : i32
    %c0_i32_0 = arith.constant 0 : i32
    return %arg0, %c0_i32 : i32, i32
  }
  func.func @transform_14(%arg0: i32) -> (i32, i32) {
    %c0_i32 = arith.constant 0 : i32
    %c0_i32_0 = arith.constant 0 : i32
    return %arg0, %c0_i32 : i32, i32
  }
  func.func @transform_15(%arg0: i32) -> (i32, i32) {
    %c0_i32 = arith.constant 0 : i32
    %c0_i32_0 = arith.constant 0 : i32
    return %arg0, %c0_i32 : i32, i32
  }
  func.func @transform_16(%arg0: i32) -> (i32, i32) {
    %c0_i32 = arith.constant 0 : i32
    %c0_i32_0 = arith.constant 0 : i32
    return %arg0, %c0_i32 : i32, i32
  }
  func.func @transform_17(%arg0: i32) -> (i32, i32) {
    %c0_i32 = arith.constant 0 : i32
    %c0_i32_0 = arith.constant 0 : i32
    return %arg0, %c0_i32 : i32, i32
  }
  func.func @transform_18(%arg0: i32) -> (i32, i32) {
    %c0_i32 = arith.constant 0 : i32
    %c0_i32_0 = arith.constant 0 : i32
    return %arg0, %c0_i32 : i32, i32
  }
  func.func @transform_19(%arg0: i32) -> (i32, i32) {
    %c0_i32 = arith.constant 0 : i32
    %c0_i32_0 = arith.constant 0 : i32
    return %arg0, %c0_i32 : i32, i32
  }
  func.func @transform_20(%arg0: i32) -> (i32, i32) {
    %c0_i32 = arith.constant 0 : i32
    %c0_i32_0 = arith.constant 0 : i32
    return %arg0, %c0_i32 : i32, i32
  }
  func.func @transform_21(%arg0: i32) -> (i32, i32) {
    %c0_i32 = arith.constant 0 : i32
    %c0_i32_0 = arith.constant 0 : i32
    return %arg0, %c0_i32 : i32, i32
  }
  func.func @transform_22(%arg0: i32) -> (i32, i32) {
    %c0_i32 = arith.constant 0 : i32
    %c0_i32_0 = arith.constant 0 : i32
    return %arg0, %c0_i32 : i32, i32
  }
  func.func @transform_23(%arg0: i32) -> (i32, i32) {
    %c0_i32 = arith.constant 0 : i32
    %c0_i32_0 = arith.constant 0 : i32
    return %arg0, %c0_i32 : i32, i32
  }
  func.func @transform_24(%arg0: i32) -> (i32, i32) {
    %c0_i32 = arith.constant 0 : i32
    %c0_i32_0 = arith.constant 0 : i32
    return %arg0, %c0_i32 : i32, i32
  }
  func.func @transform_25(%arg0: i32) -> (i32, i32) {
    %c0_i32 = arith.constant 0 : i32
    %c0_i32_0 = arith.constant 0 : i32
    return %arg0, %c0_i32 : i32, i32
  }
  func.func @transform_26(%arg0: i32) -> (i32, i32) {
    %c0_i32 = arith.constant 0 : i32
    %c0_i32_0 = arith.constant 0 : i32
    return %arg0, %c0_i32 : i32, i32
  }
  func.func @transform_27(%arg0: i32) -> (i32, i32) {
    %c0_i32 = arith.constant 0 : i32
    %c0_i32_0 = arith.constant 0 : i32
    return %arg0, %c0_i32 : i32, i32
  }
  func.func @transform_28(%arg0: i32) -> (i32, i32) {
    %c0_i32 = arith.constant 0 : i32
    %c0_i32_0 = arith.constant 0 : i32
    return %arg0, %c0_i32 : i32, i32
  }
  func.func @transform_29(%arg0: i32) -> (i32, i32) {
    %c0_i32 = arith.constant 0 : i32
    %c0_i32_0 = arith.constant 0 : i32
    return %arg0, %c0_i32 : i32, i32
  }
  func.func @transform_30(%arg0: i32) -> (i32, i32) {
    %c0_i32 = arith.constant 0 : i32
    %c0_i32_0 = arith.constant 0 : i32
    return %arg0, %c0_i32 : i32, i32
  }
  func.func @transform_31(%arg0: i32) -> (i32, i32) {
    %c0_i32 = arith.constant 0 : i32
    %c0_i32_0 = arith.constant 0 : i32
    return %arg0, %c0_i32 : i32, i32
  }
  func.func @transform_32(%arg0: i32) -> (i32, i32) {
    %c0_i32 = arith.constant 0 : i32
    %c0_i32_0 = arith.constant 0 : i32
    return %arg0, %c0_i32 : i32, i32
  }
  func.func @transform_33(%arg0: i32) -> (i32, i32) {
    %c0_i32 = arith.constant 0 : i32
    %c0_i32_0 = arith.constant 0 : i32
    %c0_i32_1 = arith.constant 0 : i32
    return %c0_i32, %c0_i32_0 : i32, i32
  }
}

</mosaic_0001>

<bundles_post_ra>
// kernel: tpu_custom_call.1
= control target key start
LH: loop header
LB: loop body
LE: loop exit
PB: predicated region body
PF: predicated region fallthrough
CT: control target
= control target key end

     0   :  { %s556_s6 = smov 1   ;;  %s557_s10 = smov 2   ;;  %s849_s0 = inlined_call_operand.smem [shape: u32[34], index: -1, kind: input, shape index: {}] }
   0x1   :  { %s602_s5 = sld [smem:[%s849_s0]]   ;;  %s558_s14 = smov 3  }
   0x2   :  { %s607_s9 = sld [smem:[%s849_s0 + %s556_s6]]   ;;  %s559_s18 = smov 4  }
   0x3   :  { %s612_s13 = sld [smem:[%s849_s0 + %s557_s10]]   ;;  %s560_s22 = smov 5  }
   0x4   :  { %s617_s17 = sld [smem:[%s849_s0 + %s558_s14]]   ;;  %s561_s26 = smov 6  }
   0x5   :  { %s622_s21 = sld [smem:[%s849_s0 + %s559_s18]]   ;;  %s562_s30 = smov 7  }
   0x6   :  { %s627_s25 = sld [smem:[%s849_s0 + %s560_s22]]   ;;  %s563_s4 = smov 8  }
   0x7   :  { %s632_s29 = sld [smem:[%s849_s0 + %s561_s26]]   ;;  %s564_s10 = smov 9  }
   0x8   :  { %s637_s3 = sld [smem:[%s849_s0 + %s562_s30]]   ;;  %s565_s15 = smov 10  }
   0x9   :  { %s642_s8 = sld [smem:[%s849_s0 + %s563_s4]]   ;;  %s566_s20 = smov 11  }
   0xa   :  { %s647_s14 = sld [smem:[%s849_s0 + %s564_s10]]   ;;  %s567_s26 = smov 12  }
   0xb   :  { %s652_s19 = sld [smem:[%s849_s0 + %s565_s15]]   ;;  %s568_s1 = smov 13  }
   0xc   :  { %s657_s24 = sld [smem:[%s849_s0 + %s566_s20]]   ;;  %s569_s7 = smov 14  }
   0xd   :  { %s662_s30 = sld [smem:[%s849_s0 + %s567_s26]]   ;;  %s570_s15 = smov 15  }
   0xe   :  { %s667_s6 = sld [smem:[%s849_s0 + %s568_s1]]   ;;  %s571_s22 = smov 16  }
   0xf   :  { %s672_s12 = sld [smem:[%s849_s0 + %s569_s7]]   ;;  %s572_s28 = smov 17  }
  0x10   :  { %s677_s20 = sld [smem:[%s849_s0 + %s570_s15]]   ;;  %s573_s7 = smov 18  }
  0x11   :  { %s682_s27 = sld [smem:[%s849_s0 + %s571_s22]]   ;;  %s574_s15 = smov 19  }
  0x12   :  { %s687_s4 = sld [smem:[%s849_s0 + %s572_s28]]   ;;  %s575_s22 = smov 20  }
  0x13   :  { %s576_s28 = smov 21  }
  0x14   :  { %850 = sst [smem:[#allocation13_spill]] %s667_s6 }
  0x15   :  { %851 = sst [smem:[#allocation14_spill]] %s672_s12 }
  0x16   :  { %852 = sst [smem:[#allocation15_spill]] %s677_s20 }
  0x17   :  { %853 = sst [smem:[#allocation16_spill]] %s682_s27 }
  0x18   :  { %854 = sst [smem:[#allocation17_spill]] %s687_s4 }
  0x19   :  { %s692_s12 = sld [smem:[%s849_s0 + %s573_s7]]   ;;  %s577_s7 = smov 22  }
  0x1a   :  { %s697_s20 = sld [smem:[%s849_s0 + %s574_s15]]   ;;  %s578_s15 = smov 23  }
  0x1b   :  { %s702_s27 = sld [smem:[%s849_s0 + %s575_s22]]   ;;  %s579_s22 = smov 24  }
  0x1c   :  { %s707_s4 = sld [smem:[%s849_s0 + %s576_s28]]   ;;  %s580_s28 = smov 25  }
  0x1d   :  { %s722_s6 = sld [smem:[%s849_s0 + %s579_s22]]   ;;  %s583_s22 = smov 28  }
  0x1f   :  { %855 = sst [smem:[#allocation18_spill]] %s692_s12 }
  0x20   :  { %856 = sst [smem:[#allocation19_spill]] %s697_s20 }
  0x21   :  { %s712_s12 = sld [smem:[%s849_s0 + %s577_s7]]   ;;  %s581_s7 = smov 26  }
  0x22   :  { %857 = sst [smem:[#allocation20_spill]] %s707_s4 }
  0x23   :  { %s717_s20 = sld [smem:[%s849_s0 + %s578_s15]]   ;;  %s582_s15 = smov 27  }
  0x24   :  { %860 = sst [smem:[#allocation23_spill]] %s722_s6 }
  0x25   :  { %s727_s4 = sld [smem:[%s849_s0 + %s580_s28]]   ;;  %s584_s28 = smov 29  }
  0x26   :  { %s742_s6 = sld [smem:[%s849_s0 + %s583_s22]]   ;;  %s587_s22 = smov 32  }
  0x27   :  { %858 = sst [smem:[#allocation21_spill]] %s712_s12 }
  0x28   :  { %s732_s12 = sld [smem:[%s849_s0 + %s581_s7]]   ;;  %s585_s7 = smov 30  }
  0x29   :  { %859 = sst [smem:[#allocation22_spill]] %s717_s20 }
  0x2a   :  { %s737_s20 = sld [smem:[%s849_s0 + %s582_s15]]   ;;  %s586_s15 = smov 31  }
  0x2b   :  { %861 = sst [smem:[#allocation24_spill]] %s727_s4 }
  0x2c   :  { %864 = sst [smem:[#allocation27_spill]] %s742_s6 }
  0x2d   :  { %s747_s4 = sld [smem:[%s849_s0 + %s584_s28]]   ;;  %s588_s28 = smov 33  }
  0x2e   :  { %862 = sst [smem:[#allocation25_spill]] %s732_s12 }
  0x2f   :  { %s752_s12 = sld [smem:[%s849_s0 + %s585_s7]]  }
  0x30   :  { %863 = sst [smem:[#allocation26_spill]] %s737_s20 }
  0x31   :  { %s757_s20 = sld [smem:[%s849_s0 + %s586_s15]]  }
  0x32   :  { %s762_s6 = sld [smem:[%s849_s0 + %s587_s22]]  }
  0x33   :  { %865 = sst [smem:[#allocation28_spill]] %s747_s4 }
  0x34   :  { %s767_s4 = sld [smem:[%s849_s0 + %s588_s28]]  }
  0x35   :  { %72 = vsyncpa [#allocation4], 0 }
  0x36   :  { %73 = vsyncpa [#allocation7], 0 }
  0x37   :  { %74 = vsyncpa [#allocation5], 0  ;;  %s589_s7 = smov [#allocation6]   ;;  %s590_s11 = smov [#allocation3]  }
  0x38   :  { %s91_s10 = sshll.u32 %s589_s7, 4  ;;  %s81_s15 = sshll.u32 %s590_s11, 4  ;;  %s92_s10 = int_to_ptr.vmem [resolvable:$true] %s91_s10  ;;  %s82_s15 = int_to_ptr.vmem [resolvable:$true] %s81_s15 }
  0x39   :  { %s462_s16 = scalar_lea.hbm %s607_s9, 64 }
  0x3a   :  { %p463_p0 = scmp.ne.s32.totalorder %s607_s9, %s462_s16  ;;  %p466_p1 = scmp.lt.u32.totalorder %s462_s16, %s607_s9 }
  0x3c   :  { %p468_p2 = pnand %p466_p1, %p463_p0 }
  0x3e   :  { %471 = shalt.err (!%p468_p2)
}
  0x3f   :  { %s472_s18 = scalar_lea.vmem %s92_s10, 64  ;;  %p477_p4 = scmp.lt.s32.totalorder %s92_s10, %s92_s10 }
  0x40   :  { %p473_p3 = scmp.ne.s32.totalorder %s92_s10, %s472_s18  ;;  %p478_p5 = scmp.lt.s32.totalorder %s472_s18, %s472_s18 }
  0x42   :  { %p479_p6 = por %p478_p5, %p477_p4 }
  0x44   :  { %p480_p7 = pnand %p479_p6, %p473_p3 }
  0x46   :  { %483 = shalt.err (!%p480_p7)
}
  0x47   :  { %94 = dma.hbm_to_vmem [thread:$0]  %s607_s9, 64, %s92_s10, [#allocation7]  }
  0x48   :  { %s484_s0 = scalar_lea.hbm %s602_s5, 64 }
  0x49   :  { %p485_p8 = scmp.ne.s32.totalorder %s602_s5, %s484_s0  ;;  %p488_p9 = scmp.lt.u32.totalorder %s484_s0, %s602_s5 }
  0x4b   :  { %p490_p10 = pnand %p488_p9, %p485_p8 }
  0x4d   :  { %493 = shalt.err (!%p490_p10)
}
  0x4e   :  { %s494_s22 = scalar_lea.vmem %s82_s15, 64  ;;  %p499_p12 = scmp.lt.s32.totalorder %s82_s15, %s82_s15 }
  0x4f   :  { %p495_p11 = scmp.ne.s32.totalorder %s82_s15, %s494_s22  ;;  %p500_p13 = scmp.lt.s32.totalorder %s494_s22, %s494_s22 }
  0x51   :  { %p501_p0 = por %p500_p13, %p499_p12 }
  0x53   :  { %p502_p1 = pnand %p501_p0, %p495_p11 }
  0x55   :  { %505 = shalt.err (!%p502_p1)
}
  0x56   :  { %84 = dma.hbm_to_vmem [thread:$0]  %s602_s5, 64, %s82_s15, [#allocation4]  }
  0x57   :  { %s591_s23 = smov [#allocation8]   ;;  %s506_s9 = scalar_lea.hbm %s702_s27, 64 }
  0x58   :  { %s137_s26 = sshll.u32 %s591_s23, 4  ;;  %p507_p2 = scmp.ne.s32.totalorder %s702_s27, %s506_s9  ;;  %s138_s26 = int_to_ptr.vmem [resolvable:$true] %s137_s26 }
  0x59   :  { %p510_p3 = scmp.lt.u32.totalorder %s506_s9, %s702_s27 }
  0x5b   :  { %p512_p4 = pnand %p510_p3, %p507_p2 }
  0x5d   :  { %515 = shalt.err (!%p512_p4)
}
  0x5e   :  { %s516_s28 = scalar_lea.vmem %s138_s26, 64  ;;  %p521_p6 = scmp.lt.s32.totalorder %s138_s26, %s138_s26 }
  0x5f   :  { %p517_p5 = scmp.ne.s32.totalorder %s138_s26, %s516_s28  ;;  %p522_p7 = scmp.lt.s32.totalorder %s516_s28, %s516_s28 }
  0x61   :  { %p523_p8 = por %p522_p7, %p521_p6 }
  0x63   :  { %p524_p9 = pnand %p523_p8, %p517_p5 }
  0x65   :  { %527 = shalt.err (!%p524_p9)
}
  0x66   :  { %140 = dma.hbm_to_vmem [thread:$0]  %s702_s27, 64, %s138_s26, [#allocation7]  }
  0x67   :  { %550 = dma.done.wait [#allocation4], 64  }
  0x68   :  { %551 = vsyncadd [#allocation4], 4294967232 }
  0x69   :  { %552 = dma.done.wait [#allocation7], 128  }
  0x6a   :  { %553 = vsyncadd [#allocation7], 4294967168  ;;  %v592_v0 = vmov 0.0   ;;  %v782_v1 = vld [vmem:[%s762_s6] sm:$0xf]  ;;  %s866_s5 = sld [smem:[#allocation13_spill]] }
  0x6b   :  { %178 = vst [vmem:[#allocation2] sm:$0xf] %v592_v0  ;;  %v184_v2 = vld [vmem:[#allocation3] sm:$0xf]  ;;  %v189_v3 = vld [vmem:[#allocation6] sm:$0xf] }
  0x6c   :  { %v185_v4 = vsub.f32 %v184_v2, %v782_v1  ;;  %v190_v5 = vsub.f32 %v189_v3, %v782_v1  ;;  %v194_v6 = vld [vmem:[%s612_s13] sm:$0xf]  ;;  %s867_s13 = sld [smem:[#allocation14_spill]]  ;;  %s878_s6 = sld [smem:[#allocation25_spill]]  ;;  %vm359_vm1 = vcmask 1043456  }
  0x6d   :  { %v199_v7 = vld [vmem:[%s617_s17] sm:$0xf]  ;;  %v195_v9 = vsub.f32 %v194_v6, %v782_v1  ;;  %s868_s17 = sld [smem:[#allocation15_spill]]  ;;  %s879_s27 = sld [smem:[#allocation26_spill]] }
  0x6e   :  { %v204_v8 = vld [vmem:[%s622_s21] sm:$0xf]  ;;  %v200_v10 = vsub.f32 %v199_v7, %v782_v1  ;;  %v187_v12 = vmul.f32 %v185_v4, %v185_v4  ;;  %v191_v13 = vadd.f32 %v190_v5, %v185_v4  ;;  %v192_v14 = vmul.f32 %v190_v5, %v190_v5  ;;  %s869_s21 = sld [smem:[#allocation16_spill]]  ;;  %s880_s1 = sld [smem:[#allocation27_spill]] }
  0x6f   :  { %v209_v11 = vld [vmem:[%s627_s25] sm:$0xf]  ;;  %v205_v15 = vsub.f32 %v204_v8, %v782_v1  ;;  %v197_v16 = vmul.f32 %v195_v9, %v195_v9  ;;  %s870_s25 = sld [smem:[#allocation17_spill]]  ;;  %s881_s2 = sld [smem:[#allocation28_spill]] }
  0x70   :  { %v214_v17 = vld [vmem:[%s632_s29] sm:$0xf]  ;;  %v193_v18 = vadd.f32 %v192_v14, %v187_v12  ;;  %v196_v19 = vadd.f32 %v195_v9, %v191_v13  ;;  %v202_v20 = vmul.f32 %v200_v10, %v200_v10  ;;  %v210_v21 = vsub.f32 %v209_v11, %v782_v1  ;;  %s871_s29 = sld [smem:[#allocation18_spill]] }
  0x71   :  { %v219_v22 = vld [vmem:[%s637_s3] sm:$0xf]  ;;  %v207_v25 = vmul.f32 %v205_v15, %v205_v15  ;;  %v215_v26 = vsub.f32 %v214_v17, %v782_v1  ;;  %s872_s3 = sld [smem:[#allocation19_spill]] }
  0x72   :  { %v198_v23 = vadd.f32 %v197_v16, %v193_v18  ;;  %v201_v24 = vadd.f32 %v200_v10, %v196_v19  ;;  %v224_v27 = vld [vmem:[%s642_s8] sm:$0xf]  ;;  %v212_v30 = vmul.f32 %v210_v21, %v210_v21  ;;  %v220_v31 = vsub.f32 %v219_v22, %v782_v1  ;;  %s873_s8 = sld [smem:[#allocation20_spill]] }
  0x73   :  { %v229_v32 = vld [vmem:[%s647_s14] sm:$0xf]  ;;  %v217_v35 = vmul.f32 %v215_v26, %v215_v26  ;;  %v225_v36 = vsub.f32 %v224_v27, %v782_v1  ;;  %s874_s14 = sld [smem:[#allocation21_spill]] }
  0x74   :  { %v203_v28 = vadd.f32 %v202_v20, %v198_v23  ;;  %v206_v29 = vadd.f32 %v205_v15, %v201_v24  ;;  %v234_v37 = vld [vmem:[%s652_s19] sm:$0xf]  ;;  %v222_v40 = vmul.f32 %v220_v31, %v220_v31  ;;  %v230_v41 = vsub.f32 %v229_v32, %v782_v1  ;;  %s875_s19 = sld [smem:[#allocation22_spill]]  ;;  %v284_v24 = vld [vmem:[#allocation8] sm:$0xf] }
  0x75   :  { %v239_v42 = vld [vmem:[%s657_s24] sm:$0xf]  ;;  %v227_v45 = vmul.f32 %v225_v36, %v225_v36  ;;  %v235_v46 = vsub.f32 %v234_v37, %v782_v1  ;;  %s876_s24 = sld [smem:[#allocation23_spill]] }
  0x76   :  { %v208_v33 = vadd.f32 %v207_v25, %v203_v28  ;;  %v211_v34 = vadd.f32 %v210_v21, %v206_v29  ;;  %v244_v47 = vld [vmem:[%s662_s30] sm:$0xf]  ;;  %v232_v50 = vmul.f32 %v230_v41, %v230_v41  ;;  %v240_v51 = vsub.f32 %v239_v42, %v782_v1  ;;  %s877_s30 = sld [smem:[#allocation24_spill]] }
  0x77   :  { %v249_v52 = vld [vmem:[%s866_s5] sm:$0xf]  ;;  %v237_v55 = vmul.f32 %v235_v46, %v235_v46  ;;  %v245_v56 = vsub.f32 %v244_v47, %v782_v1 }
  0x78   :  { %v213_v38 = vadd.f32 %v212_v30, %v208_v33  ;;  %v216_v39 = vadd.f32 %v215_v26, %v211_v34  ;;  %v254_v57 = vld [vmem:[%s867_s13] sm:$0xf]  ;;  %v242_v60 = vmul.f32 %v240_v51, %v240_v51  ;;  %v250_v61 = vsub.f32 %v249_v52, %v782_v1 }
  0x79   :  { %v259_v62 = vld [vmem:[%s868_s17] sm:$0xf]  ;;  %v247_v2 = vmul.f32 %v245_v56, %v245_v56  ;;  %v255_v3 = vsub.f32 %v254_v57, %v782_v1  ;;  %v285_v33 = vsub.f32 %v284_v24, %v782_v1 }
  0x7a   :  { %v218_v43 = vadd.f32 %v217_v35, %v213_v38  ;;  %v221_v44 = vadd.f32 %v220_v31, %v216_v39  ;;  %v264_v4 = vld [vmem:[%s869_s21] sm:$0xf]  ;;  %v252_v7 = vmul.f32 %v250_v61, %v250_v61  ;;  %v260_v8 = vsub.f32 %v259_v62, %v782_v1 }
  0x7b   :  { %v269_v9 = vld [vmem:[%s870_s25] sm:$0xf]  ;;  %v257_v12 = vmul.f32 %v255_v3, %v255_v3  ;;  %v265_v13 = vsub.f32 %v264_v4, %v782_v1  ;;  %v287_v42 = vmul.f32 %v285_v33, %v285_v33 }
  0x7c   :  { %v223_v48 = vadd.f32 %v222_v40, %v218_v43  ;;  %v226_v49 = vadd.f32 %v225_v36, %v221_v44  ;;  %v274_v14 = vld [vmem:[%s871_s29] sm:$0xf]  ;;  %v262_v17 = vmul.f32 %v260_v8, %v260_v8  ;;  %v270_v18 = vsub.f32 %v269_v9, %v782_v1 }
  0x7d   :  { %v279_v19 = vld [vmem:[%s872_s3] sm:$0xf]  ;;  %v267_v22 = vmul.f32 %v265_v13, %v265_v13  ;;  %v275_v23 = vsub.f32 %v274_v14, %v782_v1 }
  0x7e   :  { %v228_v53 = vadd.f32 %v227_v45, %v223_v48  ;;  %v231_v54 = vadd.f32 %v230_v41, %v226_v49  ;;  %v272_v27 = vmul.f32 %v270_v18, %v270_v18  ;;  %v280_v28 = vsub.f32 %v279_v19, %v782_v1  ;;  %v289_v29 = vld [vmem:[%s873_s8] sm:$0xf] }
  0x7f   :  { %v277_v32 = vmul.f32 %v275_v23, %v275_v23  ;;  %v294_v34 = vld [vmem:[%s874_s14] sm:$0xf]  ;;  %v290_v38 = vsub.f32 %v289_v29, %v782_v1 }
  0x80   :  { %v233_v58 = vadd.f32 %v232_v50, %v228_v53  ;;  %v236_v59 = vadd.f32 %v235_v46, %v231_v54  ;;  %v282_v37 = vmul.f32 %v280_v28, %v280_v28  ;;  %v299_v39 = vld [vmem:[%s875_s19] sm:$0xf]  ;;  %v295_v43 = vsub.f32 %v294_v34, %v782_v1 }
  0x81   :  { %v304_v44 = vld [vmem:[%s876_s24] sm:$0xf]  ;;  %v292_v47 = vmul.f32 %v290_v38, %v290_v38  ;;  %v300_v48 = vsub.f32 %v299_v39, %v782_v1 }
  0x82   :  { %v238_v63 = vadd.f32 %v237_v55, %v233_v58  ;;  %v241_v0 = vadd.f32 %v240_v51, %v236_v59  ;;  %v309_v49 = vld [vmem:[%s877_s30] sm:$0xf]  ;;  %v297_v52 = vmul.f32 %v295_v43, %v295_v43  ;;  %v305_v53 = vsub.f32 %v304_v44, %v782_v1 }
  0x83   :  { %v314_v54 = vld [vmem:[%s878_s6] sm:$0xf]  ;;  %v302_v57 = vmul.f32 %v300_v48, %v300_v48  ;;  %v310_v58 = vsub.f32 %v309_v49, %v782_v1 }
  0x84   :  { %v243_v5 = vadd.f32 %v242_v60, %v238_v63  ;;  %v246_v6 = vadd.f32 %v245_v56, %v241_v0  ;;  %v319_v59 = vld [vmem:[%s879_s27] sm:$0xf]  ;;  %v307_v62 = vmul.f32 %v305_v53, %v305_v53  ;;  %v315_v63 = vsub.f32 %v314_v54, %v782_v1 }
  0x85   :  { %v324_v0 = vld [vmem:[%s880_s1] sm:$0xf]  ;;  %v312_v4 = vmul.f32 %v310_v58, %v310_v58 }
  0x86   :  { %v248_v10 = vadd.f32 %v247_v2, %v243_v5  ;;  %v251_v11 = vadd.f32 %v250_v61, %v246_v6  ;;  %v320_v5 = vsub.f32 %v319_v59, %v782_v1  ;;  %v329_v6 = vld [vmem:[%s881_s2] sm:$0xf]  ;;  %v317_v9 = vmul.f32 %v315_v63, %v315_v63 }
  0x88   :  { %v253_v15 = vadd.f32 %v252_v7, %v248_v10  ;;  %v256_v16 = vadd.f32 %v255_v3, %v251_v11  ;;  %v325_v10 = vsub.f32 %v324_v0, %v782_v1  ;;  %v334_v11 = vld [vmem:[%s752_s12] sm:$0xf]  ;;  %v322_v14 = vmul.f32 %v320_v5, %v320_v5  ;;  %s593_s12 = smov [#allocation9]  }
  0x8a   :  { %v258_v20 = vadd.f32 %v257_v12, %v253_v15  ;;  %v261_v21 = vadd.f32 %v260_v8, %v256_v16  ;;  %v330_v15 = vsub.f32 %v329_v6, %v782_v1  ;;  %v339_v16 = vld [vmem:[%s757_s20] sm:$0xf]  ;;  %v327_v19 = vmul.f32 %v325_v10, %v325_v10  ;;  %s379_s20 = sshll.u32 %s593_s12, 4  ;;  %s380_s20 = int_to_ptr.vmem [resolvable:$true] %s379_s20 }
  0x8b   :  { %v340_v24 = vsub.f32 %v339_v16, %v782_v1  ;;  %s528_s11 = scalar_lea.vmem %s380_s20, 16  ;;  %s532_s15 = scalar_lea.vmem %s380_s20, 32 }
  0x8c   :  { %v263_v25 = vadd.f32 %v262_v17, %v258_v20  ;;  %v266_v26 = vadd.f32 %v265_v13, %v261_v21  ;;  %v335_v20 = vsub.f32 %v334_v11, %v782_v1  ;;  %p529_p10 = scmp.ne.s32.totalorder %s380_s20, %s528_s11  ;;  %p533_p11 = scmp.lt.s32.totalorder %s380_s20, %s380_s20 }
  0x8d   :  { %p534_p12 = scmp.lt.s32.totalorder %s532_s15, %s528_s11 }
  0x8e   :  { %v268_v30 = vadd.f32 %v267_v22, %v263_v25  ;;  %v271_v31 = vadd.f32 %v270_v18, %v266_v26 }
  0x8f   :  { %p535_p13 = por %p534_p12, %p533_p11 }
  0x90   :  { %v273_v35 = vadd.f32 %v272_v27, %v268_v30  ;;  %v276_v36 = vadd.f32 %v275_v23, %v271_v31  ;;  %v332_v23 = vmul.f32 %v330_v15, %v330_v15  ;;  %v337_v27 = vmul.f32 %v335_v20, %v335_v20 }
  0x91   :  { %v342_v31 = vmul.f32 %v340_v24, %v340_v24  ;;  %p536_p0 = pnand %p535_p13, %p529_p10 }
  0x92   :  { %v278_v40 = vadd.f32 %v277_v32, %v273_v35  ;;  %v281_v41 = vadd.f32 %v280_v28, %v276_v36  ;;  %v181_v28 = vlaneseq }
  0x94   :  { %v283_v45 = vadd.f32 %v282_v37, %v278_v40  ;;  %v286_v46 = vadd.f32 %v285_v33, %v281_v41  ;;  %v182_v34 = vshrl.u32 %v181_v28, 7  ;;  %v352_v40 = vld [vmem:[#allocation2] sm:$0xf] }
  0x96   :  { %v288_v50 = vadd.f32 %v287_v42, %v283_v45  ;;  %v291_v51 = vadd.f32 %v290_v38, %v286_v46  ;;  %vm349_vm0 = vcmp.lt.s32.totalorder %v182_v34, 4 }
  0x98   :  { %v293_v55 = vadd.f32 %v292_v47, %v288_v50  ;;  %v296_v56 = vadd.f32 %v295_v43, %v291_v51 }
  0x9a   :  { %v298_v60 = vadd.f32 %v297_v52, %v293_v55  ;;  %v301_v61 = vadd.f32 %v300_v48, %v296_v56 }
  0x9c   :  { %v303_v2 = vadd.f32 %v302_v57, %v298_v60  ;;  %v306_v3 = vadd.f32 %v305_v53, %v301_v61 }
  0x9e   :  { %v308_v7 = vadd.f32 %v307_v62, %v303_v2  ;;  %v311_v8 = vadd.f32 %v310_v58, %v306_v3 }
  0xa0   :  { %v313_v12 = vadd.f32 %v312_v4, %v308_v7  ;;  %v316_v13 = vadd.f32 %v315_v63, %v311_v8 }
  0xa2   :  { %v318_v17 = vadd.f32 %v317_v9, %v313_v12  ;;  %v321_v18 = vadd.f32 %v320_v5, %v316_v13 }
  0xa4   :  { %v323_v21 = vadd.f32 %v322_v14, %v318_v17  ;;  %v326_v22 = vadd.f32 %v325_v10, %v321_v18 }
  0xa6   :  { %v328_v25 = vadd.f32 %v327_v19, %v323_v21  ;;  %v331_v26 = vadd.f32 %v330_v15, %v326_v22 }
  0xa8   :  { %v333_v29 = vadd.f32 %v332_v23, %v328_v25  ;;  %v336_v30 = vadd.f32 %v335_v20, %v331_v26 }
  0xaa   :  { %v338_v32 = vadd.f32 %v337_v27, %v333_v29  ;;  %v341_v33 = vadd.f32 %v340_v24, %v336_v30 }
  0xac   :  { %v343_v35 = vadd.f32 %v342_v31, %v338_v32  ;;  %v345_v36 = vmul.f32 %v341_v33, %v341_v33 }
  0xae   :  { %v344_v37 = vmul.f32 0.95, %v343_v35  ;;  %v346_v38 = vmul.f32 0.0015625, %v345_v36 }
  0xb0   :  { %v347_v39 = vadd.f32 %v346_v38, %v344_v37 }
  0xb2   :  { %v350_v41 = vsel %vm349_vm0, %v347_v39, 0.0 }
  0xb3   :  { %v353_v42 = vadd.f32 %v352_v40, %v350_v41 }
  0xb5   :  { %354 = vst [vmem:[#allocation2] sm:$0xf] %v353_v42 }
  0xbc   :  { %v358_v1 = vld [vmem:[#allocation2] sm:$0xf] }
  0xbd   :  { %v360_v43 = vsel %vm359_vm1, %v358_v1, 0.0 }
  0xbe   :  { %361 = vadd.xlane.f32.xlu0 %v360_v43 }
 0x14b   :  { %v362_v44 = vpop.xlane.xlu0 %361 }
 0x14c   :  { %v363_v45 = vrot.slane %v362_v44, 4 }
 0x14e   :  { %v364_v46 = vadd.f32 %v363_v45, %v362_v44 }
 0x150   :  { %v365_v47 = vrot.slane %v364_v46, 2 }
 0x152   :  { %v366_v48 = vadd.f32 %v365_v47, %v364_v46 }
 0x154   :  { %v367_v49 = vrot.slane %v366_v48, 1 }
 0x156   :  { %v368_v50 = vadd.f32 %v367_v49, %v366_v48 }
 0x158   :  { %422 = vpush %v368_v50 }
 0x189   :  { %s423_s7 = spop %422 }
 0x18a   :  { %s370_s10 = smul.f32 0.001953125, %s423_s7 }
 0x18c   :  { %v371_v51 = vstv %s370_s10 }
 0x18d   :  { %372 = vst [vmem:[#allocation9] sm:$0x1] %v371_v51 }
 0x18e   :  { %539 = shalt.err (!%p536_p0)
}
 0x18f   :  { %s540_s16 = scalar_lea.hbm %s767_s4, 16 }
 0x190   :  { %p541_p1 = scmp.ne.s32.totalorder %s767_s4, %s540_s16  ;;  %p544_p2 = scmp.lt.u32.totalorder %s540_s16, %s767_s4 }
 0x192   :  { %p546_p3 = pnand %p544_p2, %p541_p1 }
 0x194   :  { %549 = shalt.err (!%p546_p3)
}
 0x195   :  { %382 = dma.vmem_to_hbm [thread:$0]  %s380_s20, 16, %s767_s4, [#allocation5]  }
 0x196   :  { %554 = dma.done.wait [#allocation5], 16  }
 0x197   :  { %555 = vsyncadd [#allocation5], 4294967280 }
 0x198   :  { %386 = vsyncpa [#allocation4], 1 }
 0x199   :  { %387 = vsyncpa [#allocation7], 1 }
 0x19a   :  { %388 = vsyncpa [#allocation5], 1 }

</bundles_post_ra>
